<compile_context>
chip_gen: v7x
topology: tpu7x:2x2x1
jax: 0.10.0
libtpu: 0.0.40
codegen_flags: <defaults>
</compile_context>

<pallas_src>
import functools

import jax
import jax.numpy as jnp
from jax.experimental import pallas as pl
from jax.experimental.pallas import tpu as pltpu

BN_EPS = 1e-5
_LANE = 128


def _round_up(d, m):
    return (d + m - 1) // m * m


def _vmem_budget():
    """Usable scoped-VMEM budget in bytes, derived per TPU generation."""
    try:
        cap = pltpu.get_tpu_info().vmem_capacity_bytes
    except Exception:  # pragma: no cover - conservative (v7x-sized) fallback
        cap = 64 << 20
    # Leave headroom for compiler-internal scratch: ~40 MiB on a 64 MiB part
    # (v7x), ~80 MiB on 128 MiB parts (v5e / v6e).
    return min(int(cap) * 5 // 8, 100 << 20)


def _pick_tiles(n, k_pad, m_pad, out_bytes, budget):
    """Choose (tn, tk, x_resident, single_k) under the VMEM budget.

    Preference order (per the perf review):
      1. x fully K-resident + single K step: x read from HBM exactly once,
         no f32 accumulator round-trip, minimal grid steps.
      2. x fully K-resident, K tiled: x still read exactly once.
      3. x streamed per (j, k) tile: fallback for very large n * k_pad.
    Note: preferring the largest tn collapses small problems to one column
    tile (best at SimCLR-head sizes); for large m_pad (>=1024) tn=512 still
    leaves >=2 column tiles so the "parallel" axis feeds both v7x TensorCores.
    """
    tn_opts = [t for t in (512, 256, 128) if m_pad % t == 0]
    tk_opts = [t for t in (512, 256, 128) if k_pad % t == 0]

    def fp(tn, tk, x_cols, multi_k):
        x_b = 2 * n * x_cols * 2                 # bf16 x block, double-buffered
        w_b = 2 * tk * tn * 2                    # bf16 w block, double-buffered
        gb_b = 2 * 2 * tn * 4                    # gamma + beta tiles
        o_b = 2 * n * tn * out_bytes             # output block
        acc_b = n * tn * 4 if multi_k else 0     # f32 accumulator scratch
        return x_b + w_b + gb_b + o_b + acc_b

    for tn in tn_opts:                                       # 1) single K step
        if fp(tn, k_pad, k_pad, False) <= budget:
            return tn, k_pad, True, True
    for tn in tn_opts:                                       # 2) resident x, tiled K
        for tk in tk_opts:
            if fp(tn, tk, k_pad, True) <= budget:
                return tn, tk, True, False
    for tn in tn_opts:                                       # 3) streamed x
        for tk in tk_opts:
            if fp(tn, tk, tk, True) <= budget:
                return tn, tk, False, False
    return 128, 128, False, False


def _linear_kernel(x_ref, w_ref, g_ref, b_ref, o_ref, *scratch,
                   use_bn, use_bias, relu, tk, x_resident, single_k):
    def epilogue(h):
        if use_bn:
            inv_n = 1.0 / h.shape[0]
            # Two-pass batch statistics (biased variance, PyTorch training).
            mean = jnp.sum(h, axis=0, keepdims=True) * inv_n
            c = h - mean
            var = jnp.sum(c * c, axis=0, keepdims=True) * inv_n
            h = c * jax.lax.rsqrt(var + BN_EPS)
            h = h * g_ref[...] + b_ref[...]
        elif use_bias:
            h = h + b_ref[...]
        if relu:
            h = jnp.maximum(h, 0.0)
        return h.astype(o_ref.dtype)

    if single_k:
        # Whole-K block resident: one MXU call, no accumulator, no gating.
        h = jnp.dot(x_ref[...], w_ref[...], preferred_element_type=jnp.float32)
        o_ref[...] = epilogue(h)
        return

    acc_ref = scratch[0]
    k = pl.program_id(1)

    @pl.when(k == 0)
    def _init():
        acc_ref[...] = jnp.zeros_like(acc_ref)

    if x_resident:
        start = pl.multiple_of(k * tk, _LANE)
        x_blk = x_ref[:, pl.ds(start, tk)]
    else:
        x_blk = x_ref[...]
    acc_ref[...] += jnp.dot(x_blk, w_ref[...],
                            preferred_element_type=jnp.float32)

    @pl.when(k == pl.num_programs(1) - 1)
    def _fin():
        o_ref[...] = epilogue(acc_ref[...])


# ----------------------- parameter / activation prep (hoisted) ----------------------

def prepare_params(w, gamma=None, beta=None, bias=None, *,
                   use_bn=True, use_bias=True):
    """Pad + cast parameters once (call at init, not per forward).

    w: [in_features, out_features] (pre-transposed nn.Linear weight).
    Returns (w_p bf16 [k_pad, m_pad], scale f32 [1, m_pad], shift f32 [1, m_pad], m).
    """
    k_in, m = w.shape
    k_pad, m_pad = _round_up(k_in, _LANE), _round_up(m, _LANE)
    w_p = jnp.zeros((k_pad, m_pad), jnp.bfloat16).at[:k_in, :m].set(
        w.astype(jnp.bfloat16))
    if use_bn:
        scale = gamma if gamma is not None else jnp.ones((m,), jnp.float32)
        shift = beta if beta is not None else jnp.zeros((m,), jnp.float32)
    else:
        scale = jnp.ones((m,), jnp.float32)
        shift = (bias if (use_bias and bias is not None)
                 else jnp.zeros((m,), jnp.float32))
    g_p = jnp.ones((1, m_pad), jnp.float32).at[0, :m].set(scale.astype(jnp.float32))
    b_p = jnp.zeros((1, m_pad), jnp.float32).at[0, :m].set(shift.astype(jnp.float32))
    return w_p, g_p, b_p, m


def pad_activations(x):
    """Zero-pad the feature axis to a multiple of 128 and cast to bf16."""
    n, k_in = x.shape
    k_pad = _round_up(k_in, _LANE)
    if k_pad == k_in and x.dtype == jnp.bfloat16:
        return x
    return jnp.zeros((n, k_pad), jnp.bfloat16).at[:, :k_in].set(
        x.astype(jnp.bfloat16))


# --------------------------------- kernel caller ------------------------------------

def linear_layer_padded(x_p, w_p, g_p, b_p, *, use_bn=True, use_bias=True,
                        relu=False, out_dtype=jnp.float32):
    """Fused Linear (+ BatchNorm1d / bias) (+ ReLU) on pre-padded operands.

    x_p: [n, k_pad] bf16, w_p: [k_pad, m_pad] bf16, g_p/b_p: [1, m_pad] f32.
    Returns the padded output [n, m_pad] in out_dtype.
    """
    n, k_pad = x_p.shape
    k_w, m_pad = w_p.shape
    assert k_pad == k_w, "x / w inner dims mismatch"

    out_bytes = jnp.dtype(out_dtype).itemsize
    budget = _vmem_budget()
    tn, tk, x_resident, single_k = _pick_tiles(n, k_pad, m_pad, out_bytes, budget)

    grid = (m_pad // tn, k_pad // tk)

    if x_resident:
        # Constant block index along both grid axes -> x DMA'd from HBM once.
        x_spec = pl.BlockSpec((n, k_pad), lambda j, k: (0, 0))
    else:
        x_spec = pl.BlockSpec((n, tk), lambda j, k: (0, k))

    scratch = [] if single_k else [pltpu.VMEM((n, tn), jnp.float32)]

    # Real double-buffered footprint + headroom, clamped to the generation cap.
    fp = (2 * n * (k_pad if x_resident else tk) * 2
          + 2 * tk * tn * 2
          + 4 * tn * 4
          + 2 * n * tn * out_bytes
          + (0 if single_k else n * tn * 4))
    vmem_limit = min(max(fp + (2 << 20), 16 << 20), budget)

    kernel = functools.partial(
        _linear_kernel, use_bn=use_bn, use_bias=use_bias, relu=relu,
        tk=tk, x_resident=x_resident, single_k=single_k)

    return pl.pallas_call(
        kernel,
        out_shape=jax.ShapeDtypeStruct((n, m_pad), out_dtype),
        grid_spec=pltpu.PrefetchScalarGridSpec(
            num_scalar_prefetch=0,
            grid=grid,
            in_specs=[
                x_spec,                                        # activations
                pl.BlockSpec((tk, tn), lambda j, k: (k, j)),   # weight tile
                pl.BlockSpec((1, tn), lambda j, k: (0, j)),    # gamma / scale
                pl.BlockSpec((1, tn), lambda j, k: (0, j)),    # beta / bias
            ],
            out_specs=pl.BlockSpec((n, tn), lambda j, k: (0, j)),
            scratch_shapes=scratch,
        ),
        compiler_params=pltpu.CompilerParams(
            dimension_semantics=("parallel", "arbitrary"),
            vmem_limit_bytes=vmem_limit,
        ),
    )(x_p, w_p, g_p, b_p)


def linear_layer(x, w, gamma=None, beta=None, bias=None, *,
                 use_bn=True, use_bias=True, relu=False,
                 out_dtype=jnp.float32):
    """Convenience wrapper: pads / casts per call. Hoist prepare_params() out
    of the hot path when the same parameters are reused (see projection_head)."""
    assert x.shape[1] == w.shape[0], "x / w inner dims mismatch"
    w_p, g_p, b_p, m = prepare_params(w, gamma, beta, bias,
                                      use_bn=use_bn, use_bias=use_bias)
    x_p = pad_activations(x)
    out_p = linear_layer_padded(x_p, w_p, g_p, b_p, use_bn=use_bn,
                                use_bias=use_bias, relu=relu,
                                out_dtype=out_dtype)
    return out_p[:, :m]


def projection_head(x, w1, gamma1, beta1, w2, gamma2, beta2):
    """SimCLR projection head = LinearLayer(bn) -> ReLU -> LinearLayer(bn).

    Parameter padding / casting is done once; the padded bf16 intermediate of
    layer 1 (padded columns are exactly zero after BN+ReLU) feeds layer 2
    directly, so no slice / re-pad and half the intermediate HBM traffic.
    """
    w1p, g1p, b1p, _ = prepare_params(w1, gamma1, beta1, use_bn=True)
    w2p, g2p, b2p, m2 = prepare_params(w2, gamma2, beta2, use_bn=True)
    x_p = pad_activations(x)
    h_p = linear_layer_padded(x_p, w1p, g1p, b1p, use_bn=True, relu=True,
                              out_dtype=jnp.bfloat16)
    z_p = linear_layer_padded(h_p, w2p, g2p, b2p, use_bn=True, relu=False,
                              out_dtype=jnp.float32)
    return z_p[:, :m2]


# ----------------------------- pure-JAX references -----------------------------

def linear_layer_ref(x, w, gamma=None, beta=None, bias=None, *,
                     use_bn=True, use_bias=True, relu=False):
    y = x @ w
    if use_bn:
        m = y.mean(0, keepdims=True)
        v = ((y - m) ** 2).mean(0, keepdims=True)
        y = (y - m) / jnp.sqrt(v + BN_EPS) * gamma + beta
    elif use_bias:
        y = y + bias
    if relu:
        y = jnp.maximum(y, 0.0)
    return y


def projection_head_ref(x, w1, g1, b1, w2, g2, b2):
    h = linear_layer_ref(x, w1, g1, b1, use_bn=True, relu=True)
    return linear_layer_ref(h, w2, g2, b2, use_bn=True, relu=False)


# TODO(synk): BatchNorm1d running_mean / running_var buffer updates (a training
# side effect of the PyTorch module) are not emitted; only the forward output
# (batch-statistics normalization) is computed.

if __name__ == "__main__":
    # Small shapes consistent with the module: in=200 exercises the padding
    # path (200 -> 256), hidden=256 and out=96 -> 128 padded column tiles.
    # (Don't benchmark at n=16 -- this is a correctness demo only.)
    batch = 16
    in_features, hidden_features, out_features = 200, 256, 96

    key = jax.random.PRNGKey(0)
    kx, kw1, kw2, kg1, kb1, kg2, kb2, kbias = jax.random.split(key, 8)

    x = jax.random.normal(kx, (batch, in_features), jnp.float32)

    bound1 = 1.0 / jnp.sqrt(in_features)
    bound2 = 1.0 / jnp.sqrt(hidden_features)
    w1 = jax.random.uniform(kw1, (in_features, hidden_features),
                            minval=-bound1, maxval=bound1, dtype=jnp.float32)
    w2 = jax.random.uniform(kw2, (hidden_features, out_features),
                            minval=-bound2, maxval=bound2, dtype=jnp.float32)
    gamma1 = 1.0 + 0.1 * jax.random.normal(kg1, (hidden_features,), jnp.float32)
    beta1 = 0.1 * jax.random.normal(kb1, (hidden_features,), jnp.float32)
    gamma2 = 1.0 + 0.1 * jax.random.normal(kg2, (out_features,), jnp.float32)
    beta2 = 0.1 * jax.random.normal(kb2, (out_features,), jnp.float32)
    bias1 = 0.1 * jax.random.normal(kbias, (hidden_features,), jnp.float32)

    # (1) LinearLayer(use_bias=True, use_bn=False): plain Linear + bias.
    y_lin = jax.block_until_ready(
        linear_layer(x, w1, bias=bias1, use_bn=False, use_bias=True))
    y_lin_ref = linear_layer_ref(x, w1, bias=bias1, use_bn=False, use_bias=True)
    assert y_lin.shape == (batch, hidden_features)
    assert jnp.allclose(y_lin, y_lin_ref, atol=5e-2, rtol=5e-2), \
        "LinearLayer (bias) mismatch vs reference"

    # (2) LinearLayer(use_bn=True): Linear(no bias) + BatchNorm1d (batch stats).
    y_bn = jax.block_until_ready(
        linear_layer(x, w1, gamma1, beta1, use_bn=True))
    y_bn_ref = linear_layer_ref(x, w1, gamma1, beta1, use_bn=True)
    assert y_bn.shape == (batch, hidden_features)
    assert jnp.allclose(y_bn, y_bn_ref, atol=5e-2, rtol=5e-2), \
        "LinearLayer (BN) mismatch vs reference"

    # (3) SimCLR projection head composed of two LinearLayer kernels + ReLU.
    z = jax.block_until_ready(
        projection_head(x, w1, gamma1, beta1, w2, gamma2, beta2))
    z_ref = projection_head_ref(x, w1, gamma1, beta1, w2, gamma2, beta2)
    assert z.shape == (batch, out_features)
    assert jnp.allclose(z, z_ref, atol=5e-2, rtol=5e-2), \
        "projection head mismatch vs reference"

    print("KERNEL_OK")
</pallas_src>

<mosaic_0001>
module attributes {stable_mosaic.version = 11 : i64} {
  func.func @_linear_kernel(%arg0: i32, %arg1: i32, %arg2: memref<16x256xbf16, #tpu.memory_space<vmem>>, %arg3: memref<256x256xbf16, #tpu.memory_space<vmem>>, %arg4: memref<1x256xf32, #tpu.memory_space<vmem>>, %arg5: memref<1x256xf32, #tpu.memory_space<vmem>>, %arg6: memref<16x256xf32, #tpu.memory_space<vmem>>) attributes {dimension_semantics = [#tpu.dimension_semantics<parallel>, #tpu.dimension_semantics<arbitrary>], iteration_bounds = array<i64: 1, 1>, scalar_prefetch = 0 : i64, scratch_operands = 0 : i64, tpu.core_type = #tpu.core_type<tc>, window_params = [{pipeline_mode = #tpu.pipeline_mode<synchronous>, transform_indices = @transform_0, window_bounds = array<i64: 16, 256>}, {transform_indices = @transform_1, window_bounds = array<i64: 256, 256>}, {transform_indices = @transform_2, window_bounds = array<i64: 1, 256>}, {transform_indices = @transform_3, window_bounds = array<i64: 1, 256>}, {transform_indices = @transform_4, window_bounds = array<i64: 16, 256>}]} {
    %c0 = arith.constant 0 : index
    %c0_0 = arith.constant 0 : index
    %0 = vector.load %arg2[%c0, %c0_0] : memref<16x256xbf16, #tpu.memory_space<vmem>>, vector<16x256xbf16>
    %c0_1 = arith.constant 0 : index
    %c0_2 = arith.constant 0 : index
    %1 = vector.load %arg3[%c0_1, %c0_2] : memref<256x256xbf16, #tpu.memory_space<vmem>>, vector<256x256xbf16>
    %cst = arith.constant dense<0.000000e+00> : vector<16x256xf32>
    %2 = tpu.matmul %0, %1, %cst {dimension_numbers = #tpu.dot_dimension_numbers<[1], [0], [0], [1], [0, 0, 1, 1], [], []>} : vector<16x256xbf16>, vector<256x256xbf16>, vector<16x256xf32> -> vector<16x256xf32>
    %c0_3 = arith.constant 0 : index
    %c0_4 = arith.constant 0 : index
    %3 = vector.load %arg5[%c0_3, %c0_4] : memref<1x256xf32, #tpu.memory_space<vmem>>, vector<1x256xf32>
    %4 = vector.broadcast %3 : vector<1x256xf32> to vector<16x256xf32>
    %5 = arith.addf %2, %4 : vector<16x256xf32>
    %c0_5 = arith.constant 0 : index
    %c0_6 = arith.constant 0 : index
    %6 = vector.load %arg6[%c0_5, %c0_6] : memref<16x256xf32, #tpu.memory_space<vmem>>, vector<16x256xf32>
    tpu.vector_store %arg6[%c0_5, %c0_6], %5 {strides = array<i32>} : memref<16x256xf32, #tpu.memory_space<vmem>>, vector<16x256xf32>,
    return
  }
  func.func @transform_0(%arg0: i32, %arg1: i32) -> (i32, i32) {
    %c0_i32 = arith.constant 0 : i32
    %c0_i32_0 = arith.constant 0 : i32
    %c0_i32_1 = arith.constant 0 : i32
    return %c0_i32, %c0_i32_0 : i32, i32
  }
  func.func @transform_1(%arg0: i32, %arg1: i32) -> (i32, i32) {
    %c0_i32 = arith.constant 0 : i32
    return %arg1, %arg0 : i32, i32
  }
  func.func @transform_2(%arg0: i32, %arg1: i32) -> (i32, i32) {
    %c0_i32 = arith.constant 0 : i32
    %c0_i32_0 = arith.constant 0 : i32
    return %c0_i32, %arg0 : i32, i32
  }
  func.func @transform_3(%arg0: i32, %arg1: i32) -> (i32, i32) {
    %c0_i32 = arith.constant 0 : i32
    %c0_i32_0 = arith.constant 0 : i32
    return %c0_i32, %arg0 : i32, i32
  }
  func.func @transform_4(%arg0: i32, %arg1: i32) -> (i32, i32) {
    %c0_i32 = arith.constant 0 : i32
    %c0_i32_0 = arith.constant 0 : i32
    return %c0_i32, %arg0 : i32, i32
  }
}

</mosaic_0001>

<bundles_post_ra>
// kernel: tpu_custom_call.1
= control target key start
LH: loop header
LB: loop body
LE: loop exit
PB: predicated region body
PF: predicated region fallthrough
CT: control target
= control target key end

     0   :  { %9 = vsyncpa [#allocation3], 0  ;;  %s562_s0 = inlined_call_operand.hbm [shape: bf16[16,256], index: 0, kind: input, shape index: {}]   ;;  %s563_s1 = inlined_call_operand.hbm [shape: bf16[256,256], index: 1, kind: input, shape index: {}]   ;;  %s564_s2 = inlined_call_operand.vmem [shape: f32[1,256], index: 2, kind: input, shape index: {}]   ;;  %s565_s3 = inlined_call_operand.vmem [shape: f32[1,256], index: 3, kind: input, shape index: {}]   ;;  %s566_s4 = inlined_call_operand.hbm [shape: f32[16,256], index: 4, kind: output, shape index: {}]  }
   0x1   :  { %10 = vsyncpa [#allocation6], 0 }
   0x2   :  { %11 = vsyncpa [#allocation4], 0  ;;  %s491_s15 = smov [#allocation2]   ;;  %s419_s19 = scalar_lea.hbm %s562_s0, 256 }
   0x3   :  { %s17_s16 = sshll.u32 %s491_s15, 4  ;;  %p420_p0 = scmp.ne.s32.totalorder %s562_s0, %s419_s19  ;;  %s18_s16 = int_to_ptr.vmem [resolvable:$true] %s17_s16 }
   0x4   :  { %p423_p1 = scmp.lt.u32.totalorder %s419_s19, %s562_s0 }
   0x6   :  { %p425_p2 = pnand %p423_p1, %p420_p0 }
   0x8   :  { %428 = shalt.err (!%p425_p2)
}
   0x9   :  { %s429_s23 = scalar_lea.vmem %s18_s16, 256  ;;  %p434_p4 = scmp.lt.s32.totalorder %s18_s16, %s18_s16 }
   0xa   :  { %p430_p3 = scmp.ne.s32.totalorder %s18_s16, %s429_s23  ;;  %p435_p5 = scmp.lt.s32.totalorder %s429_s23, %s429_s23 }
   0xc   :  { %p436_p6 = por %p435_p5, %p434_p4 }
   0xe   :  { %p437_p7 = pnand %p436_p6, %p430_p3 }
  0x10   :  { %440 = shalt.err (!%p437_p7)
}
  0x11   :  { %s492_s24 = smov 128   ;;  %s493_s25 = smov 8  }
  0x12   :  { %23 = dma.hbm_to_vmem [thread:$0]  %s562_s0, 256, %s18_s16, [#allocation3], %s492_s24, %s492_s24, %s493_s25  }
  0x13   :  { %s494_s28 = smov [#allocation5]   ;;  %s441_s6 = scalar_lea.hbm %s563_s1, 4096 }
  0x14   :  { %s29_s29 = sshll.u32 %s494_s28, 4  ;;  %p442_p8 = scmp.ne.s32.totalorder %s563_s1, %s441_s6  ;;  %s30_s29 = int_to_ptr.vmem [resolvable:$true] %s29_s29 }
  0x15   :  { %p445_p9 = scmp.lt.u32.totalorder %s441_s6, %s563_s1 }
  0x17   :  { %p447_p10 = pnand %p445_p9, %p442_p8 }
  0x19   :  { %450 = shalt.err (!%p447_p10)
}
  0x1a   :  { %s451_s11 = scalar_lea.vmem %s30_s29, 4096  ;;  %p456_p12 = scmp.lt.s32.totalorder %s30_s29, %s30_s29 }
  0x1b   :  { %p452_p11 = scmp.ne.s32.totalorder %s30_s29, %s451_s11  ;;  %p457_p13 = scmp.lt.s32.totalorder %s451_s11, %s451_s11 }
  0x1d   :  { %p458_p0 = por %p457_p13, %p456_p12 }
  0x1f   :  { %p459_p1 = pnand %p458_p0, %p452_p11 }
  0x21   :  { %462 = shalt.err (!%p459_p1)
}
  0x22   :  { %35 = dma.hbm_to_vmem [thread:$0]  %s563_s1, 4096, %s30_s29, [#allocation6], %s492_s24, %s492_s24, %s493_s25  }
  0x23   :  { %485 = dma.done.wait [#allocation3], 256  }
  0x24   :  { %486 = vsyncadd [#allocation3], 4294967040 }
  0x25   :  { %487 = dma.done.wait [#allocation6], 4096  }
  0x26   :  { %488 = vsyncadd [#allocation6], 4294963200  ;;  %v368_v0 = vld [vmem:[#allocation5 + $0x4] ss:$8 sps:$4 sm:$0xff]   ;;  %v370_v1 = vld [vmem:[#allocation5] ss:$8 sps:$4 sm:$0xff]   ;;  %v82_v34 = vlaneseq }
  0x27   :  { %262 = vmatprep.subr.bf16.mxu0 %v368_v0  ;;  %v371_v2 = vld [vmem:[#allocation5 + $0x14] ss:$8 sps:$4 sm:$0xff]   ;;  %v373_v3 = vld [vmem:[#allocation5 + $0x10] ss:$8 sps:$4 sm:$0xff]   ;;  %v374_v4 = vld [vmem:[#allocation5 + $0x24] ss:$8 sps:$4 sm:$0xff]  }
  0x28   :  { %263 = vmatpush1.bf16.msra.mxu0 %v370_v1  ;;  %v376_v5 = vld [vmem:[#allocation5 + $0x20] ss:$8 sps:$4 sm:$0xff]   ;;  %v377_v6 = vld [vmem:[#allocation5 + $0x34] ss:$8 sps:$4 sm:$0xff]   ;;  %v379_v7 = vld [vmem:[#allocation5 + $0x30] ss:$8 sps:$4 sm:$0xff]  }
  0x29   :  { %264 = vmatprep.subr.bf16.mxu0 %v371_v2  ;;  %v380_v8 = vld [vmem:[#allocation5 + $0x44] ss:$8 sps:$4 sm:$0xff]   ;;  %v382_v9 = vld [vmem:[#allocation5 + $0x40] ss:$8 sps:$4 sm:$0xff]   ;;  %v383_v10 = vld [vmem:[#allocation5 + $0x54] ss:$8 sps:$4 sm:$0xff]  }
  0x2a   :  { %v385_v11 = vld [vmem:[#allocation5 + $0x50] ss:$8 sps:$4 sm:$0xff]   ;;  %v386_v12 = vld [vmem:[#allocation5 + $0x64] ss:$8 sps:$4 sm:$0xff]   ;;  %v418_v13 = vld [vmem:[#allocation2 + $0x4] ss:$8 sps:$4 sm:$0xff]  }
  0x2b   :  { %v388_v14 = vld [vmem:[#allocation5 + $0x60] ss:$8 sps:$4 sm:$0xff]   ;;  %v389_v15 = vld [vmem:[#allocation5 + $0x74] ss:$8 sps:$4 sm:$0xff]   ;;  %294 = vmatprep.mubr.bf16.mxu0 %v418_v13  ;;  %v391_v16 = vld [vmem:[#allocation5 + $0x70] ss:$8 sps:$4 sm:$0xff]  }
  0x2c   :  { %265 = vmatpush1.bf16.msra.mxu0 %v373_v3  ;;  %v392_v17 = vld [vmem:[#allocation5 + $0x84] ss:$8 sps:$4 sm:$0xff]   ;;  %v394_v18 = vld [vmem:[#allocation5 + $0x80] ss:$8 sps:$4 sm:$0xff]   ;;  %v395_v19 = vld [vmem:[#allocation5 + $0x94] ss:$8 sps:$4 sm:$0xff]  }
  0x2d   :  { %266 = vmatprep.subr.bf16.mxu0 %v374_v4  ;;  %v397_v20 = vld [vmem:[#allocation5 + $0x90] ss:$8 sps:$4 sm:$0xff]   ;;  %v398_v21 = vld [vmem:[#allocation5 + $0xa4] ss:$8 sps:$4 sm:$0xff]   ;;  %v400_v22 = vld [vmem:[#allocation5 + $0xa0] ss:$8 sps:$4 sm:$0xff]  }
  0x2e   :  { %v401_v23 = vld [vmem:[#allocation5 + $0xb4] ss:$8 sps:$4 sm:$0xff]   ;;  %v403_v24 = vld [vmem:[#allocation5 + $0xb0] ss:$8 sps:$4 sm:$0xff]   ;;  %v404_v25 = vld [vmem:[#allocation5 + $0xc4] ss:$8 sps:$4 sm:$0xff]  }
  0x2f   :  { %v406_v26 = vld [vmem:[#allocation5 + $0xc0] ss:$8 sps:$4 sm:$0xff]   ;;  %v407_v27 = vld [vmem:[#allocation5 + $0xd4] ss:$8 sps:$4 sm:$0xff]   ;;  %v409_v28 = vld [vmem:[#allocation5 + $0xd0] ss:$8 sps:$4 sm:$0xff]  }
  0x30   :  { %267 = vmatpush1.bf16.msra.mxu0 %v376_v5  ;;  %v410_v29 = vld [vmem:[#allocation5 + $0xe4] ss:$8 sps:$4 sm:$0xff]   ;;  %v412_v30 = vld [vmem:[#allocation5 + $0xe0] ss:$8 sps:$4 sm:$0xff]   ;;  %v413_v31 = vld [vmem:[#allocation5 + $0xf4] ss:$8 sps:$4 sm:$0xff]  }
  0x31   :  { %268 = vmatprep.subr.bf16.mxu0 %v377_v6  ;;  %v415_v32 = vld [vmem:[#allocation5 + $0xf0] ss:$8 sps:$4 sm:$0xff]   ;;  %v83_v35 = vshrl.u32 %v82_v34, 7  ;;  %s495_s14 = smov [#allocation7]  }
  0x32   :  { %v416_v33 = vld [vmem:[#allocation2] ss:$8 sps:$4 sm:$0xff]   ;;  %s314_s15 = sshll.u32 %s495_s14, 4  ;;  %s315_s15 = int_to_ptr.vmem [resolvable:$true] %s314_s15 }
  0x33   :  { %v84_v36 = vsub.s32 0, %v83_v35  ;;  %v80_v37 = vld [vmem:[%s565_s3] sm:$0x3]  ;;  %v88_v38 = vsub.s32 1, %v83_v35  ;;  %s463_s16 = scalar_lea.vmem %s315_s15, 512  ;;  %p468_p3 = scmp.lt.s32.totalorder %s315_s15, %s315_s15 }
  0x34   :  { %269 = vmatpush1.bf16.msra.mxu0 %v379_v7  ;;  %p464_p2 = scmp.ne.s32.totalorder %s315_s15, %s463_s16  ;;  %p469_p4 = scmp.lt.s32.totalorder %s463_s16, %s463_s16 }
  0x35   :  { %270 = vmatprep.subr.bf16.mxu0 %v380_v8  ;;  %v85_v39 = vrot.slane %v80_v37, %v84_v36  ;;  %v89_v40 = vrot.slane %v80_v37, %v88_v38 }
  0x36   :  { %p470_p5 = por %p469_p4, %p468_p3 }
  0x38   :  { %271 = vmatpush1.bf16.msra.mxu0 %v382_v9  ;;  %p471_p6 = pnand %p470_p5, %p464_p2 }
  0x39   :  { %272 = vmatprep.subr.bf16.mxu0 %v383_v10 }
  0x3c   :  { %273 = vmatpush1.bf16.msra.mxu0 %v385_v11 }
  0x3d   :  { %274 = vmatprep.subr.bf16.mxu0 %v386_v12 }
  0x40   :  { %275 = vmatpush1.bf16.msra.mxu0 %v388_v14 }
  0x41   :  { %276 = vmatprep.subr.bf16.mxu0 %v389_v15 }
  0x44   :  { %277 = vmatpush1.bf16.msra.mxu0 %v391_v16 }
  0x45   :  { %278 = vmatprep.subr.bf16.mxu0 %v392_v17 }
  0x48   :  { %279 = vmatpush1.bf16.msra.mxu0 %v394_v18 }
  0x49   :  { %280 = vmatprep.subr.bf16.mxu0 %v395_v19 }
  0x4c   :  { %281 = vmatpush1.bf16.msra.mxu0 %v397_v20 }
  0x4d   :  { %282 = vmatprep.subr.bf16.mxu0 %v398_v21 }
  0x50   :  { %283 = vmatpush1.bf16.msra.mxu0 %v400_v22 }
  0x51   :  { %284 = vmatprep.subr.bf16.mxu0 %v401_v23 }
  0x54   :  { %285 = vmatpush1.bf16.msra.mxu0 %v403_v24 }
  0x55   :  { %286 = vmatprep.subr.bf16.mxu0 %v404_v25 }
  0x58   :  { %287 = vmatpush1.bf16.msra.mxu0 %v406_v26 }
  0x59   :  { %288 = vmatprep.subr.bf16.mxu0 %v407_v27 }
  0x5c   :  { %289 = vmatpush1.bf16.msra.mxu0 %v409_v28 }
  0x5d   :  { %290 = vmatprep.subr.bf16.mxu0 %v410_v29 }
  0x60   :  { %291 = vmatpush1.bf16.msra.mxu0 %v412_v30 }
  0x61   :  { %292 = vmatprep.subr.bf16.mxu0 %v413_v31 }
  0x64   :  { %293 = vmatpush1.bf16.msra.mxu0 %v415_v32 }
  0x67   :  { %295 = vmatmul.mubr.bf16.vlgmr.msra.gmra.mrb[0].mxu0 %v416_v33 }
 0x13a   :  { %v296_v41 = vpop.f32.mrb[0].mxu0 }
 0x13b   :  { %v297_v42 = vadd.f32 %v296_v41, %v85_v39  ;;  %v298_v43 = vpop.f32.mrb[1].mxu0 }
 0x13c   :  { %v299_v44 = vadd.f32 %v298_v43, %v89_v40  ;;  %v300_v45 = vpop.f32.mrb[2].mxu0 }
 0x13d   :  { %305 = vst [vmem:[#allocation7] sm:$0xff] %v297_v42  ;;  %v301_v46 = vadd.f32 %v300_v45, %v85_v39  ;;  %v302_v47 = vpop.f32.mrb[3].mxu0 }
 0x13e   :  { %306 = vst [vmem:[#allocation7 + $0x8] sm:$0xff] %v299_v44  ;;  %v303_v48 = vadd.f32 %v302_v47, %v89_v40 }
 0x13f   :  { %307 = vst [vmem:[#allocation7 + $0x10] sm:$0xff] %v301_v46 }
 0x140   :  { %308 = vst [vmem:[#allocation7 + $0x18] sm:$0xff] %v303_v48 }
 0x141   :  { %474 = shalt.err (!%p471_p6)
}
 0x142   :  { %s475_s18 = scalar_lea.hbm %s566_s4, 512 }
 0x143   :  { %p476_p7 = scmp.ne.s32.totalorder %s566_s4, %s475_s18  ;;  %p479_p8 = scmp.lt.u32.totalorder %s475_s18, %s566_s4 }
 0x145   :  { %p481_p9 = pnand %p479_p8, %p476_p7 }
 0x147   :  { %484 = shalt.err (!%p481_p9)
}
 0x148   :  { %s496_s22 = smov 256   ;;  %s497_s23 = smov 16  }
 0x149   :  { %320 = dma.vmem_to_hbm [thread:$0]  %s315_s15, 512, %s566_s4, [#allocation4], %s496_s22, %s496_s22, %s497_s23  }
 0x14a   :  { %489 = dma.done.wait [#allocation4], 512  }
 0x14b   :  { %490 = vsyncadd [#allocation4], 4294966784 }
 0x14c   :  { %324 = vsyncpa [#allocation3], 1 }
 0x14d   :  { %325 = vsyncpa [#allocation6], 1 }
 0x14e   :  { %326 = vsyncpa [#allocation4], 1 }

</bundles_post_ra>
